<compile_context>
chip_gen: v5e
topology: v5e:2x2
jax: 0.10.0
libtpu: 0.0.40
codegen_flags: <defaults>
</compile_context>

<pallas_src>
import jax
import jax.numpy as jnp
from jax.experimental import pallas as pl
from jax.experimental.pallas import tpu as pltpu


_NUM_CORE_SPLIT = 2      # leading "parallel" grid axis (both TCs on v7x)
_OUT_LANES = 128         # lane-dense per-core output block width


def _nll_loss_kernel(prob_ref, weight_ref, target_ref, out_ref, acc_ref):
    i = pl.program_id(1)

    @pl.when(i == 0)
    def _():
        acc_ref[...] = jnp.zeros_like(acc_ref)

    prob = prob_ref[...]            # (TILE_N, C)  f32 or bf16
    w = weight_ref[...]             # (1, C)       f32
    tgt = target_ref[...]           # (TILE_N, 1)  i32 ; -1 marks padded rows

    tn, c = prob.shape
    col = jax.lax.broadcasted_iota(jnp.int32, (tn, c), 1)

    # NaN-safe select: unselected (possibly -inf / garbage) entries become 0
    # BEFORE any arithmetic.  Padded / overhang rows carry target == -1 and
    # never match a column, so they contribute exactly 0.
    sel = jnp.where(col == tgt, prob, jnp.zeros_like(prob)).astype(jnp.float32)

    # Fused weight-multiply + C-wide reduction on the MXU:
    #   (1, C) . (TILE_N, C)^T -> (1, TILE_N)   (lane-dense result)
    # Weights stay f32; HIGHEST precision keeps f32-accurate accumulation.
    row = jax.lax.dot_general(
        w, sel,
        dimension_numbers=(((1,), (1,)), ((), ())),
        precision=jax.lax.Precision.HIGHEST,
        preferred_element_type=jnp.float32,
    )                                # (1, TILE_N) f32

    acc_ref[...] += jnp.sum(row, axis=1, keepdims=True)

    @pl.when(i == pl.num_programs(1) - 1)
    def _():
        out_ref[...] = jnp.broadcast_to(-acc_ref[...], (1, _OUT_LANES))


def _round_up(x, m):
    return ((x + m - 1) // m) * m


def _vmem_capacity_bytes():
    """Per-core VMEM capacity; conservative (v7x) fallback if query fails."""
    try:
        cap = getattr(pltpu.get_tpu_info(), "vmem_capacity_bytes", None)
        if cap:
            return int(cap)
    except Exception:
        pass
    return 64 * 1024 * 1024


def nll_loss(prob, target, weight, *, max_tile_rows=None):
    """prob: (N, C) f32/bf16, target: (N,) int, weight: (C,) float -> scalar f32."""
    n, c = prob.shape
    if prob.dtype not in (jnp.float32, jnp.bfloat16):
        prob = prob.astype(jnp.float32)
    itemsize = jnp.dtype(prob.dtype).itemsize
    sublane = 8 if itemsize == 4 else 16
    c_lanes = _round_up(c, 128)

    # Generation-aware tile sizing from the *lane-padded* row width.  Each row
    # costs c_lanes*itemsize (prob) + 128*4 (lane-padded i32 target) of VMEM.
    vmem_cap = _vmem_capacity_bytes()
    per_buffer_budget = vmem_cap // 6           # ~10.6 MiB v7x, ~21 MiB v5e/v6e
    bytes_per_row = c_lanes * itemsize + 128 * 4
    tile_n = max(sublane, (per_buffer_budget // bytes_per_row) // sublane * sublane)
    # No hard 1024-row cap; only cap at "half the rows" so both v7x cores get
    # work (costs at most one extra ~0.35 us step on single-core chips).
    tile_n = min(tile_n, _round_up(pl.cdiv(n, _NUM_CORE_SPLIT), sublane))
    if max_tile_rows is not None:               # test hook: force small tiles
        tile_n = min(tile_n, max(sublane, max_tile_rows // sublane * sublane))

    num_tiles = pl.cdiv(n, tile_n)              # logical row tiles of prob
    tiles_per_core = pl.cdiv(num_tiles, _NUM_CORE_SPLIT)
    total_tiles = tiles_per_core * _NUM_CORE_SPLIT
    max_block = num_tiles - 1

    # Only the tiny target vector is padded (fill = -1); prob is untouched.
    target = target.astype(jnp.int32)
    n_tgt = total_tiles * tile_n
    if n_tgt != n:
        target = jnp.pad(target, (0, n_tgt - n), constant_values=-1)
    target2d = target.reshape(n_tgt, 1)
    weight2d = weight.astype(jnp.float32).reshape(1, c)

    def prob_map(p, i):
        # Clamp: overhang tiles re-read the last real block; their targets are
        # -1 so they contribute exactly 0 (no OOB block indices ever issued).
        return (jnp.minimum(p * tiles_per_core + i, max_block), 0)

    def tgt_map(p, i):
        return (p * tiles_per_core + i, 0)      # always inside padded target

    # Double-buffered prob+target stream, pinned weight row, small slack.
    vmem_need = (2 * tile_n * bytes_per_row
                 + 2 * 8 * c_lanes * 4
                 + (1 << 20))
    vmem_limit = int(min(vmem_cap // 2,
                         max(16 * 1024 * 1024, vmem_need * 5 // 4)))

    out = pl.pallas_call(
        _nll_loss_kernel,
        out_shape=jax.ShapeDtypeStruct((1, _NUM_CORE_SPLIT * _OUT_LANES),
                                       jnp.float32),
        grid_spec=pltpu.PrefetchScalarGridSpec(
            num_scalar_prefetch=0,
            grid=(_NUM_CORE_SPLIT, tiles_per_core),
            in_specs=[
                pl.BlockSpec((tile_n, c), prob_map),           # prob tile
                pl.BlockSpec((1, c), lambda p, i: (0, 0)),     # weight (pinned)
                pl.BlockSpec((tile_n, 1), tgt_map),            # target tile
            ],
            out_specs=pl.BlockSpec((1, _OUT_LANES), lambda p, i: (0, p)),
            scratch_shapes=[pltpu.VMEM((1, 1), jnp.float32)],
        ),
        compiler_params=pltpu.CompilerParams(
            dimension_semantics=("parallel", "arbitrary"),
            vmem_limit_bytes=vmem_limit,
        ),
    )(prob, weight2d, target2d)

    # Each core's (negated) partial sits in lane 0 of its 128-lane block.
    partials = out.reshape(_NUM_CORE_SPLIT, _OUT_LANES)[:, 0]
    return jnp.sum(partials)


def nll_loss_ref(prob, target, weight):
    """Pure-JAX reference mirroring the PyTorch module (gather form, NaN-safe)."""
    tgt = target.astype(jnp.int32)
    p = jnp.take_along_axis(prob.astype(jnp.float32), tgt[:, None], axis=1)[:, 0]
    w = weight.astype(jnp.float32)[tgt]
    return -jnp.sum(w * p)


if __name__ == "__main__":
    key = jax.random.PRNGKey(0)

    def make_case(key, n, c, dtype):
        k1, k2, k3 = jax.random.split(key, 3)
        logits = jax.random.normal(k1, (n, c), dtype=jnp.float32)
        prob = jax.nn.log_softmax(logits, axis=-1).astype(dtype)
        target = jax.random.randint(k2, (n,), 0, c, dtype=jnp.int32)
        weight = jax.random.uniform(k3, (c,), dtype=jnp.float32)
        return prob, target, weight

    cases = [
        # SeqGAN-style: batch=2, seq=8 -> N=16 rows, vocab C=32, f32.
        dict(n=16, c=32, dtype=jnp.float32, rtol=1e-5, atol=1e-5, cap=None),
        # Non-aligned N and C exercise the partial-tile / -1-padding path.
        dict(n=13, c=50, dtype=jnp.float32, rtol=1e-5, atol=1e-5, cap=None),
        # bf16 prob streamed without a wrapper-side f32 cast.
        dict(n=16, c=32, dtype=jnp.bfloat16, rtol=1e-4, atol=1e-4, cap=None),
        # Multi-step accumulation + clamped overhang tile on the 2-way split.
        dict(n=100, c=64, dtype=jnp.float32, rtol=1e-5, atol=1e-4, cap=16),
    ]

    for idx, cs in enumerate(cases):
        key, sub = jax.random.split(key)
        prob, target, weight = make_case(sub, cs["n"], cs["c"], cs["dtype"])
        out = jax.block_until_ready(
            nll_loss(prob, target, weight, max_tile_rows=cs["cap"]))
        ref = nll_loss_ref(prob, target, weight)
        assert jnp.allclose(out, ref, rtol=cs["rtol"], atol=cs["atol"]), (idx, out, ref)

    print("KERNEL_OK")
</pallas_src>

<mosaic_0001>
module attributes {stable_mosaic.version = 11 : i64} {
  func.func @_nll_loss_kernel(%arg0: i32, %arg1: i32, %arg2: memref<8x32xf32, #tpu.memory_space<vmem>>, %arg3: memref<1x32xf32, #tpu.memory_space<vmem>>, %arg4: memref<8x1xi32, #tpu.memory_space<vmem>>, %arg5: memref<1x128xf32, #tpu.memory_space<vmem>>, %arg6: memref<1x1xf32, #tpu.memory_space<vmem>>) attributes {dimension_semantics = [#tpu.dimension_semantics<parallel>, #tpu.dimension_semantics<arbitrary>], iteration_bounds = array<i64: 2, 1>, scalar_prefetch = 0 : i64, scratch_operands = 1 : i64, tpu.core_type = #tpu.core_type<tc>, window_params = [{transform_indices = @transform_0, window_bounds = array<i64: 8, 32>}, {pipeline_mode = #tpu.pipeline_mode<synchronous>, transform_indices = @transform_1, window_bounds = array<i64: 1, 32>}, {transform_indices = @transform_2, window_bounds = array<i64: 8, 1>}, {transform_indices = @transform_3, window_bounds = array<i64: 1, 128>}]} {
    %c0_i32 = arith.constant 0 : i32
    %0 = arith.cmpi eq, %arg1, %c0_i32 : i32
    %1 = arith.extui %0 : i1 to i32
    %c0_i32_0 = arith.constant 0 : i32
    %2 = arith.cmpi ne, %1, %c0_i32_0 : i32
    scf.if %2 {
      %cst_14 = arith.constant 0.000000e+00 : f32
      %20 = vector.broadcast %cst_14 : f32 to vector<1x1xf32>
      %c0_15 = arith.constant 0 : index
      %c0_16 = arith.constant 0 : index
      %21 = vector.load %arg6[%c0_15, %c0_16] : memref<1x1xf32, #tpu.memory_space<vmem>>, vector<1x1xf32>
      tpu.vector_store %arg6[%c0_15, %c0_16], %20 {strides = array<i32>} : memref<1x1xf32, #tpu.memory_space<vmem>>, vector<1x1xf32>,
    } else {
    }
    %c0 = arith.constant 0 : index
    %c0_1 = arith.constant 0 : index
    %3 = vector.load %arg2[%c0, %c0_1] : memref<8x32xf32, #tpu.memory_space<vmem>>, vector<8x32xf32>
    %c0_2 = arith.constant 0 : index
    %c0_3 = arith.constant 0 : index
    %4 = vector.load %arg3[%c0_2, %c0_3] : memref<1x32xf32, #tpu.memory_space<vmem>>, vector<1x32xf32>
    %c0_4 = arith.constant 0 : index
    %c0_5 = arith.constant 0 : index
    %5 = vector.load %arg4[%c0_4, %c0_5] : memref<8x1xi32, #tpu.memory_space<vmem>>, vector<8x1xi32>
    %6 = tpu.iota {dimensions = array<i32: 1>} : vector<8x32xi32>
    %7 = vector.broadcast %5 : vector<8x1xi32> to vector<8x32xi32>
    %8 = arith.cmpi eq, %6, %7 : vector<8x32xi32>
    %cst = arith.constant 0.000000e+00 : f32
    %9 = vector.broadcast %cst : f32 to vector<8x32xf32>
    %10 = arith.select %8, %3, %9 : vector<8x32xi1>, vector<8x32xf32>
    %cst_6 = arith.constant dense<0.000000e+00> : vector<1x8xf32>
    %11 = tpu.matmul %4, %10, %cst_6 {dimension_numbers = #tpu.dot_dimension_numbers<[1], [1], [0], [0], [0, 0, 1, 0], [], []>, precision = #tpu.contract_precision<fp32>} : vector<1x32xf32>, vector<8x32xf32>, vector<1x8xf32> -> vector<1x8xf32>
    %c0_7 = arith.constant 0 : index
    %c0_8 = arith.constant 0 : index
    %12 = vector.load %arg6[%c0_7, %c0_8] : memref<1x1xf32, #tpu.memory_space<vmem>>, vector<1x1xf32>
    %cst_9 = arith.constant dense<0.000000e+00> : vector<1xf32>
    %13 = vector.multi_reduction <add>, %11, %cst_9 [1] : vector<1x8xf32> to vector<1xf32>
    %14 = vector.shape_cast %13 : vector<1xf32> to vector<1x1xf32>
    %15 = arith.addf %12, %14 : vector<1x1xf32>
    %c0_10 = arith.constant 0 : index
    %c0_11 = arith.constant 0 : index
    %16 = vector.load %arg6[%c0_10, %c0_11] : memref<1x1xf32, #tpu.memory_space<vmem>>, vector<1x1xf32>
    tpu.vector_store %arg6[%c0_10, %c0_11], %15 {strides = array<i32>} : memref<1x1xf32, #tpu.memory_space<vmem>>, vector<1x1xf32>,
    %c0_i32_12 = arith.constant 0 : i32
    %17 = arith.cmpi eq, %arg1, %c0_i32_12 : i32
    %18 = arith.extui %17 : i1 to i32
    %c0_i32_13 = arith.constant 0 : i32
    %19 = arith.cmpi ne, %18, %c0_i32_13 : i32
    scf.if %19 {
      %c0_14 = arith.constant 0 : index
      %c0_15 = arith.constant 0 : index
      %20 = vector.load %arg6[%c0_14, %c0_15] : memref<1x1xf32, #tpu.memory_space<vmem>>, vector<1x1xf32>
      %cst_16 = arith.constant 0.000000e+00 : f32
      %21 = vector.broadcast %cst_16 : f32 to vector<1x1xf32>
      %22 = arith.subf %21, %20 : vector<1x1xf32>
      %23 = vector.shape_cast %22 : vector<1x1xf32> to vector<1x1xf32>
      %24 = vector.broadcast %23 : vector<1x1xf32> to vector<1x128xf32>
      %c0_17 = arith.constant 0 : index
      %c0_18 = arith.constant 0 : index
      %25 = vector.load %arg5[%c0_17, %c0_18] : memref<1x128xf32, #tpu.memory_space<vmem>>, vector<1x128xf32>
      tpu.vector_store %arg5[%c0_17, %c0_18], %24 {strides = array<i32>} : memref<1x128xf32, #tpu.memory_space<vmem>>, vector<1x128xf32>,
    } else {
    }
    return
  }
  func.func @transform_0(%arg0: i32, %arg1: i32) -> (i32, i32) {
    %c1_i32 = arith.constant 1 : i32
    %0 = arith.muli %arg0, %c1_i32 : i32
    %1 = arith.addi %0, %arg1 : i32
    %c1_i32_0 = arith.constant 1 : i32
    %2 = arith.minsi %1, %c1_i32_0 : i32
    %c0_i32 = arith.constant 0 : i32
    %c0_i32_1 = arith.constant 0 : i32
    return %2, %c0_i32 : i32, i32
  }
  func.func @transform_1(%arg0: i32, %arg1: i32) -> (i32, i32) {
    %c0_i32 = arith.constant 0 : i32
    %c0_i32_0 = arith.constant 0 : i32
    %c0_i32_1 = arith.constant 0 : i32
    return %c0_i32, %c0_i32_0 : i32, i32
  }
  func.func @transform_2(%arg0: i32, %arg1: i32) -> (i32, i32) {
    %c1_i32 = arith.constant 1 : i32
    %0 = arith.muli %arg0, %c1_i32 : i32
    %1 = arith.addi %0, %arg1 : i32
    %c0_i32 = arith.constant 0 : i32
    %c0_i32_0 = arith.constant 0 : i32
    return %1, %c0_i32 : i32, i32
  }
  func.func @transform_3(%arg0: i32, %arg1: i32) -> (i32, i32) {
    %c0_i32 = arith.constant 0 : i32
    %c0_i32_0 = arith.constant 0 : i32
    return %c0_i32, %arg0 : i32, i32
  }
}

</mosaic_0001>

<bundles_post_ra>
// kernel: tpu_custom_call.1
= control target key start
LH: loop header
LB: loop body
LE: loop exit
PB: predicated region body
PF: predicated region fallthrough
CT: control target
= control target key end

     0   :  { %8 = vsyncpa [#allocation4], 0  ;;  %s777_s0 = inlined_call_operand.vmem [shape: f32[16,32], index: 0, kind: input, shape index: {}]   ;;  %s778_s1 = inlined_call_operand.vmem [shape: f32[1,32], index: 1, kind: input, shape index: {}]   ;;  %s779_s2 = inlined_call_operand.vmem [shape: s32[16,1], index: 2, kind: input, shape index: {}]   ;;  %s780_s3 = inlined_call_operand.hbm [shape: f32[1,256], index: 3, kind: output, shape index: {}]  }
   0x1   :  { %10 = vsyncpa [#allocation4 + $0x1], 0  ;;  %s672_s12 = smov 0   ;;  %s674_s13 = smov 0  }
   0x2   :  { %s676_s14 = smov 0   ;;  %s678_s15 = smov 0  }
   0x3   :  { %s680_s16 = smov 0   ;;  %s682_s17 = smov 0  }
   0x4 LB: > { %s499_s18 = sadd.s32 4294967295, %s648_s17   ;;  %s500_s19 = sadd.s32 4294967294, %s648_s17   ;;  %s648_s17 = sphi %s682_s17, %s16_s17   ;;  %s644_s16 = sphi %s680_s16, %s787_s16   ;;  %s640_s15 = sphi %s678_s15, %s786_s15   ;;  %s636_s14 = sphi %s676_s14, %s785_s14   ;;  %s632_s13 = sphi %s674_s13, %s784_s13   ;;  %s628_s12 = sphi %s672_s12, %s783_s12  }
   0x5   : > { %s28_s20 = sadd.s32 1, %s644_s16  ;;  %s116_s21 = sadd.s32 1, %s636_s14 }
   0x6   : > { %p30_p0 = scmp.ge.s32.totalorder %s28_s20, 2  ;;  %p126_p1 = scmp.ne.s32.totalorder %s636_s14, %s632_s13 }
   0x7   : > { %p127_p2 = scmp.eq.s32.totalorder %s499_s18, 1  ;;  %p132_p3 = scmp.ne.s32.totalorder %s632_s13, %s628_s12 }
   0x8   : > { %s789_s20 = smov (%p30_p0, %s28_s20), 0  ;;  %p133_p5 = scmp.eq.s32.totalorder %s500_s19, 1 }
   0x9   : > { %p712_p4 = por %p127_p2, %p126_p1  ;;  %s113_s23 = ssub.s32 %s644_s16, %s789_s20 }
   0xa   : > { %p503_p6 = scmp.ge.s32.totalorder %s648_s17, 1  ;;  %p114_p7 = scmp.eq.s32.totalorder %s113_s23, 0 }
   0xb   : > { %p719_p8 = por %p133_p5, %p132_p3  ;;  %p176_p9 = scmp.lt.s32.totalorder %s648_s17, 3 }
   0xc   : > { %s725_s25 = scalar_select %p114_p7, %s636_s14, %s116_s21  }
   0xd   : > { %p177_p10 = pnand %p503_p6, %p176_p9 }
   0xe   : > { %p207_p11 = scmp.lt.s32.totalorder (!%p177_p10), %s640_s15, 1  ;;  %s204_s10 = sand.u32 (!%p177_p10), 1, %s632_s13  }
   0xf   : > { %180 = sbr.rel (%p177_p10) target bundleno = 541 (0x21d), region = 32  ;;  %s420_s19 = scalar_lea.hbm (!%p177_p10), %s780_s3, %s640_s15 }
  0x10   : > { %s205_s21 = scalar_lea.vmem (!%p177_p10), [#allocation3], %s204_s10 }
  0x11   : > { %s422_s23 = sshll.u32 (!%p177_p10), %s205_s21, 4  ;;  %s423_s23 = int_to_ptr.vmem [resolvable:$true] %s422_s23 }
  0x14   : > { %v650_v0 = vmov 0   ;;  %s208_s26 = scalar_select %p207_p11, %s640_s15, 1  ;;  %v229_v2 = vld [vmem:[%s778_s1] sm:$0x1]  ;;  %vm238_vm0 = vcmask 261120   ;;  %v231_v5 = vlaneseq  ;;  %vm226_vm2 = vcmask 0  }
  0x15   : > { %568 = vset.pattern.permute.xlu0 %v650_v0  ;;  %569 = vset.pattern.permute.xlu1 %v650_v0  ;;  %v240_v3 = vsel %vm238_vm0, %v229_v2, 0  ;;  %v651_v20 = vmov 0.0   ;;  %vm392_vm3 = vcmask 57344   ;;  %s590_s15 = scalar_lea.hbm %s780_s3, 2 }
  0x16   : > { %s508_s27 = sshll.u32 %s208_s26, 3  ;;  %s791_s26 = smov (!%p207_p11, %s208_s26), 1  ;;  %v262_v4 = vand.u32 4294901760, %v240_v3  ;;  %v232_v7 = vand.u32 127, %v231_v5  ;;  %227 = vst.msk [vmem:[#allocation2] sm:$0x1] %vm226_vm2, %v651_v20 }
  0x17   : > { %s220_s30 = scalar_lea.vmem %s779_s2, %s508_s27  ;;  %s507_s6 = sshll.u32 %s791_s26, 3 }
  0x18   : > { %v230_v1 = vld [vmem:[%s220_s30] sm:$0xff]  ;;  %v263_v6 = vsub.f32 %v240_v3, %v262_v4  ;;  %s212_s9 = scalar_lea.vmem %s777_s0, %s507_s6  ;;  %s424_s26 = sshll.u32 %s420_s19, 4  ;;  %s425_s26 = int_to_ptr.hbm [resolvable:$true] %s424_s26 }
  0x19   : > { %234 = vperm.xlu0 %568, %v230_v1   ;;  %v228_v9 = vld [vmem:[%s212_s9] sm:$0xff]  ;;  %s412_s27 = scalar_lea.sflag [#allocation4], %s204_s10  ;;  %s584_s28 = sshra.s32 %s425_s26, 4  ;;  %s585_s28 = int_to_ptr.hbm [resolvable:$true] %s584_s28 }
  0x1a   : > { %v264_v8 = vand.u32 4294901760, %v263_v6  ;;  %s586_s29 = scalar_lea.hbm %s585_s28, 1  ;;  %p591_p1 = scmp.lt.s32.totalorder %s585_s28, %s780_s3 }
  0x1b   : > { %p587_p12 = scmp.ne.s32.totalorder %s585_s28, %s586_s29  ;;  %p592_p2 = scmp.lt.s32.totalorder %s590_s15, %s586_s29 }
  0x1c   : > { %v265_v11 = vsub.f32 %v263_v6, %v264_v8 }
  0x1d   : > { %v391_v33 = vld [vmem:[#allocation2] sm:$0x1]  ;;  %p588_p13 = pnand %p587_p12, %p712_p4  ;;  %p593_p3 = por %p592_p2, %p591_p1 }
  0x1e   : > { %v266_v15 = vand.u32 4294901760, %v265_v11 }
  0x1f   : > { %p589_p0 = pneg %p588_p13 }
  0x21   : > { %p594_p5 = pnand %p593_p3, %p589_p0 }
  0x8b   : > { %v235_v10 = vpop.permute.xlu0 %234 }
  0x8c   : > { %vm236_vm1 = vcmp.eq.s32.totalorder %v232_v7, %v235_v10 }
  0x8d   : > { %v237_v12 = vsel %vm236_vm1, %v228_v9, 0.0 }
  0x8e   : > { %v243_v13 = vsel %vm238_vm0, %v237_v12, 0 }
  0x8f   : > { %v260_v14 = vand.u32 4294901760, %v243_v13 }
  0x91   : > { %v287_v16 = vsub.f32 %v243_v13, %v260_v14  ;;  %261 = vmatpush.xpose.msra.mxu0 %v260_v14  ;;  %337 = vmatpush.xpose.msra.mxu3 %v260_v14 }
  0x93   : > { %314 = vmatpush.xpose.msra.mxu2 %v287_v16  ;;  %v288_v17 = vand.u32 4294901760, %v287_v16 }
  0x94   : > { %267 = vmatmul.f32.vlgmr.msra.gmra.mxu0 %v266_v15  ;;  %341 = vmatmul.f32.vlgmr.msra.gmra.mxu3 %v264_v8 }
  0x95   : > { %363 = vmatpush.xpose.msrb.mxu0 %v288_v17  ;;  %v289_v18 = vsub.f32 %v287_v16, %v288_v17 }
  0x96   : > { %317 = vmatmul.f32.vlgmr.msra.gmra.mxu2 %v263_v6 }
  0x97   : > { %v290_v19 = vand.u32 4294901760, %v289_v18 }
  0x99   : > { %291 = vmatpush.xpose.msra.mxu1 %v290_v19 }
  0x9c   : > { %293 = vmatmul.f32.vlgmr.msra.gmra.mxu1 %v262_v4  ;;  %365 = vmatmul.f32.vlgmr.msrb.gmra.mxu0 %v262_v4 }
  0x9d   : > { %385 = vmatpush.xpose.msrb.mxu1 %v260_v14 }
  0xa4   : > { %387 = vmatmul.f32.vlgmr.msrb.gmra.mxu1 %v262_v4 }
 0x111   : > { %v268_v21 = vpop.f32.mrf.mxu0 }
 0x117   : > { %v342_v25 = vpop.f32.mrf.mxu3 }
 0x119   : > { %v294_v22 = vpop.f32.mrf.mxu1  ;;  %v318_v23 = vpop.f32.mrf.mxu2 }
 0x11a   : > { %v295_v24 = vadd.f32 %v294_v22, %v268_v21  ;;  %v366_v27 = vpop.f32.mrf.mxu0 }
 0x11c   : > { %v319_v26 = vadd.f32 %v318_v23, %v295_v24 }
 0x11e   : > { %v343_v28 = vadd.f32 %v342_v25, %v319_v26 }
 0x120   : > { %v367_v29 = vadd.f32 %v366_v27, %v343_v28 }
 0x121   : > { %v388_v30 = vpop.f32.mrf.mxu1 }
 0x122   : > { %v389_v31 = vadd.f32 %v388_v30, %v367_v29 }
 0x124   : > { %v393_v32 = vsel %vm392_vm3, %v389_v31, 0.0 }
 0x125   : > { %394 = vadd.xlane.f32.xlu0 %v393_v32 }
 0x198   : > { %v395_v34 = vpop.xlane.xlu0 %394 }
 0x199   : > { %v396_v35 = vadd.f32 %v395_v34, %v391_v33 }
 0x19b   : > { %398 = vst.msk [vmem:[#allocation2] sm:$0x1] %vm226_vm2, %v396_v35 }
 0x1a2   : > { %v402_v36 = vld [vmem:[#allocation2] sm:$0x1] }
 0x1a3   : > { %v403_v37 = vsub.f32 0.0, %v402_v36 }
 0x1a5   : > { %406 = vperm.xlu1 %569, %v403_v37  }
 0x217   : > { %v407_v38 = vpop.permute.xlu1 %406 }
 0x218   : > { %v409_v39 = vperm.slane %v407_v38, 0 }
 0x21a   : > { %410 = vst [vmem:[%s205_s21] sm:$0x1] %v409_v39 }
 0x21b   : > { %597 = shalt.err (!%p594_p5)
}
 0x21c   : > { %511 = dma.vmem_to_hbm [thread:$0]  (%p712_p4), %s423_s23, 16, %s425_s26, %s412_s27  }
 0x21d PF: > { %p517_p6 = scmp.ge.s32.totalorder %s648_s17, 2  ;;  %s436_s7 = sand.u32 1, %s628_s12  }
 0x21e   : > { %s437_s8 = scalar_lea.sflag [#allocation4], %s436_s7 }
 0x21f   : > { %p514_p7 = pnand %p517_p6, %p719_p8 }
 0x221   : > { %p515_p9 = pneg %p514_p7 }
 0x223   : > { %623 = dma.done.wait (%p515_p9), %s437_s8, 16  }
 0x224   : > { %625 = vsyncadd (%p515_p9), %s437_s8, 4294967280  ;;  %s16_s17 = sadd.s32 1, %s648_s17   ;;  %s783_s12 = smov %s632_s13 }
 0x225   : > { %p13_p10 = scmp.ge.s32.totalorder %s16_s17, 4   ;;  %s784_s13 = smov %s636_s14 }
 0x226   : > { %s785_s14 = smov %s725_s25  ;;  %s786_s15 = smov %s644_s16 }
 0x227   : > { %s787_s16 = smov %s789_s20  ;;  %15 = sbr.rel (!%p13_p10) target bundleno = 4 (0x4), region = 78 }
 0x22c   :  { %442 = vsyncpa [#allocation4], 1 }
 0x22d   :  { %444 = vsyncpa [#allocation4 + $0x1], 1 }

</bundles_post_ra>
